<compile_context>
chip_gen: v6e
topology: v6e:2x2x1
jax: 0.10.0
libtpu: 0.0.40
codegen_flags: <defaults>
</compile_context>

<pallas_src>
import math

import numpy as np

import jax
import jax.numpy as jnp
from jax.experimental import pallas as pl
from jax.experimental.pallas import tpu as pltpu


# -----------------------------------------------------------------------------
# Host-side (numpy, static) construction of the per-axis synthesis matrices.
# -----------------------------------------------------------------------------

def _reflect_np(x, minx, maxx):
    """Same as promptHSI.reflect (symmetric boundary index map)."""
    x = np.asanyarray(x)
    rng = maxx - minx
    rng_by_2 = 2 * rng
    mod = np.fmod(x - minx, rng_by_2)
    normed_mod = np.where(mod < 0, mod + rng_by_2, mod)
    out = np.where(normed_mod >= rng, rng_by_2 - normed_mod, normed_mod) + minx
    return np.array(out, dtype=x.dtype)


def _sfb1d_matrix(n, g):
    """(n, n) matrix M such that M @ x equals one filter's contribution to
    sfb1d_atrous along an axis of length n:
      0.5 * conv_transpose( symmetric_pad(x), g, stride=1, padding=L ).
    Folds the symmetric padding, the transposed convolution and the /2."""
    g = np.asarray(g, dtype=np.float64).ravel()
    L = g.size
    fsz = L                      # dilation == 1 in the module
    a = fsz // 2
    b = fsz // 2 + (fsz + 1) % 2
    n_pad = n + a + b
    out_len = n_pad + L - 1 - 2 * fsz
    assert out_len == n, "even-length synthesis filters expected (size-preserving)"
    xe = _reflect_np(np.arange(-b, n + a, dtype=np.int32), -0.5, n - 0.5).astype(np.int64)
    m_mat = np.zeros((n, n), dtype=np.float64)
    for o in range(n):
        for m in range(L):
            j = o + fsz - m          # conv_transpose: Y[o] = sum_m g[m]*x_pad[o+P-m]
            if 0 <= j < n_pad:
                m_mat[o, xe[j]] += g[m]
    return m_mat * 0.5               # the "/ (2 * dilation)" of sfb1d_atrous


# -----------------------------------------------------------------------------
# Pallas kernel: all SWT synthesis levels for one batch element, fused.
# grid = (B, n_levels); the level axis carries ll in VMEM scratch.
# -----------------------------------------------------------------------------

def _swt_fused_kernel(a0_ref, a1_ref, b0_ref, b1_ref, yl_ref, c_ref,
                      o_ref, ll_ref):
    # a0_ref/a1_ref : (H, H)  column-stage matrices for g0/g1 (incl. /2, pad)
    # b0_ref/b1_ref : (W, W)  row-stage matrices, PRE-TRANSPOSED (incl. /2, pad)
    # yl_ref        : (H, W)  coarsest-level lowpass (channel 0 of coeffs[-1])
    # c_ref         : (3, H, W)  this level's [lh, hl, hh] planes
    # o_ref         : (H, W)  final reconstructed image plane
    # ll_ref        : (H, W)  VMEM scratch carrying ll across the level axis
    lvl = pl.program_id(1)

    @pl.when(lvl == 0)
    def _():
        ll_ref[...] = yl_ref[...]

    ll = ll_ref[...]
    lh = c_ref[0]
    hl = c_ref[1]
    hh = c_ref[2]

    a0 = a0_ref[...]
    a1 = a1_ref[...]
    # Column (H) synthesis — MXU accumulation replaces the old sublane concat.
    lo = (jnp.dot(a0, ll, preferred_element_type=jnp.float32)
          + jnp.dot(a1, lh, preferred_element_type=jnp.float32))
    hi = (jnp.dot(a0, hl, preferred_element_type=jnp.float32)
          + jnp.dot(a1, hh, preferred_element_type=jnp.float32))

    # Row (W) synthesis — right-multiply by pre-transposed matrices so W stays
    # the lane axis (no transposes).
    y = (jnp.dot(lo, b0_ref[...], preferred_element_type=jnp.float32)
         + jnp.dot(hi, b1_ref[...], preferred_element_type=jnp.float32))

    ll_ref[...] = y                                   # carry to next level

    @pl.when(lvl == pl.num_programs(1) - 1)
    def _():
        o_ref[...] = y.astype(o_ref.dtype)


def swt_inverse(coeffs, g0_rec, g1_rec):
    """coeffs: list of (B, 4, H, W) arrays (finest ... coarsest), channel order
    [ll, lh, hl, hh].  Returns the reconstructed image, shape (B, 1, H, W)."""
    b, nc, h, w = coeffs[-1].shape
    assert nc == 4
    n_levels = len(coeffs)

    a0 = jnp.asarray(_sfb1d_matrix(h, g0_rec), jnp.float32)        # (H, H)
    a1 = jnp.asarray(_sfb1d_matrix(h, g1_rec), jnp.float32)        # (H, H)
    b0t = jnp.asarray(_sfb1d_matrix(w, g0_rec).T, jnp.float32)     # (W, W)
    b1t = jnp.asarray(_sfb1d_matrix(w, g1_rec).T, jnp.float32)     # (W, W)

    yl = coeffs[-1][:, 0].astype(jnp.float32)                      # (B, H, W)
    # Band planes only (drop dead channel 0), coarsest -> finest, laid out as
    # (B, n_levels, 3, H, W) then flattened to (B*n_levels, 3, H, W) so a
    # single leading block index addresses one (batch, level) slab.
    bands = jnp.stack([c[:, 1:4] for c in coeffs[::-1]], axis=1)
    bands = bands.reshape(b * n_levels, 3, h, w).astype(jnp.float32)

    out = pl.pallas_call(
        _swt_fused_kernel,
        out_shape=jax.ShapeDtypeStruct((b, h, w), jnp.float32),
        grid=(b, n_levels),
        in_specs=[
            pl.BlockSpec((h, h), lambda i, l: (0, 0)),             # A_g0
            pl.BlockSpec((h, h), lambda i, l: (0, 0)),             # A_g1
            pl.BlockSpec((w, w), lambda i, l: (0, 0)),             # B_g0^T
            pl.BlockSpec((w, w), lambda i, l: (0, 0)),             # B_g1^T
            pl.BlockSpec((None, h, w), lambda i, l: (i, 0, 0)),    # yl
            pl.BlockSpec((None, 3, h, w),
                         lambda i, l: (i * n_levels + l, 0, 0, 0)),  # bands
        ],
        out_specs=pl.BlockSpec((None, h, w), lambda i, l: (i, 0, 0)),
        scratch_shapes=[pltpu.VMEM((h, w), jnp.float32)],
        compiler_params=pltpu.CompilerParams(
            dimension_semantics=("parallel", "arbitrary")),
    )(a0, a1, b0t, b1t, yl, bands)

    return out[:, None, :, :]                                       # (B,1,H,W)


# -----------------------------------------------------------------------------
# Pure-numpy reference mirroring the PyTorch forward (pad + conv_transpose + /2)
# -----------------------------------------------------------------------------

def _conv_transpose_full_crop(x, g, crop):
    """Stride-1 transposed conv along the last axis (full conv, crop each side)."""
    g = np.asarray(g, np.float64).ravel()
    L = g.size
    n = x.shape[-1]
    out = np.zeros(x.shape[:-1] + (n + L - 1,), dtype=np.float64)
    for m in range(L):
        out[..., m:m + n] += g[m] * x
    return out[..., crop:out.shape[-1] - crop]


def _sfb1d_ref(lo, hi, g0, g1, axis):
    g0 = np.asarray(g0, np.float64).ravel()
    g1 = np.asarray(g1, np.float64).ravel()
    L = g0.size
    fsz = L
    a = fsz // 2
    b = fsz // 2 + (fsz + 1) % 2
    n = lo.shape[axis]
    xe = _reflect_np(np.arange(-b, n + a, dtype=np.int32), -0.5, n - 0.5).astype(np.int64)
    lo_p = np.moveaxis(np.take(lo, xe, axis=axis), axis, -1)
    hi_p = np.moveaxis(np.take(hi, xe, axis=axis), axis, -1)
    y = (_conv_transpose_full_crop(lo_p, g0, fsz)
         + _conv_transpose_full_crop(hi_p, g1, fsz))
    return np.moveaxis(y, -1, axis) / 2.0


def _swt_inverse_ref(coeffs, g0, g1):
    ll = np.asarray(coeffs[-1][:, 0], np.float64)       # yl
    for c in coeffs[::-1]:
        c = np.asarray(c, np.float64)
        lh, hl, hh = c[:, 1], c[:, 2], c[:, 3]
        lo = _sfb1d_ref(ll, lh, g0, g1, axis=1)          # column (H) stage
        hi = _sfb1d_ref(hl, hh, g0, g1, axis=1)
        ll = _sfb1d_ref(lo, hi, g0, g1, axis=2)          # row (W) stage
    return ll[:, None]


if __name__ == "__main__":
    B, C, H, W = 2, 4, 16, 16

    key = jax.random.PRNGKey(0)
    k0, k1 = jax.random.split(key)
    # Two-level stationary-wavelet coefficient pyramid (same H, W per level),
    # each level (B, 4, H, W) with channels [ll, lh, hl, hh].
    coeffs = [
        jax.random.normal(k0, (B, C, H, W), dtype=jnp.float32),
        jax.random.normal(k1, (B, C, H, W), dtype=jnp.float32),
    ]

    # db1 (Haar) reconstruction filters: pywt.Wavelet('db1').rec_lo / rec_hi.
    s = 1.0 / math.sqrt(2.0)
    g0 = [s, s]
    g1 = [s, -s]

    out = swt_inverse(coeffs, g0, g1)
    out = jax.block_until_ready(out)

    ref = _swt_inverse_ref([np.asarray(c) for c in coeffs], g0, g1)
    assert out.shape == (B, 1, H, W)
    assert np.allclose(np.asarray(out), ref, rtol=1e-3, atol=1e-3), "mismatch vs reference"

    print("KERNEL_OK")
</pallas_src>

<mosaic_0001>
module attributes {stable_mosaic.version = 11 : i64} {
  func.func @_swt_fused_kernel(%arg0: i32, %arg1: i32, %arg2: memref<16x16xf32, #tpu.memory_space<vmem>>, %arg3: memref<16x16xf32, #tpu.memory_space<vmem>>, %arg4: memref<16x16xf32, #tpu.memory_space<vmem>>, %arg5: memref<16x16xf32, #tpu.memory_space<vmem>>, %arg6: memref<1x16x16xf32, #tpu.memory_space<vmem>>, %arg7: memref<1x3x16x16xf32, #tpu.memory_space<vmem>>, %arg8: memref<1x16x16xf32, #tpu.memory_space<vmem>>, %arg9: memref<16x16xf32, #tpu.memory_space<vmem>>) attributes {dimension_semantics = [#tpu.dimension_semantics<parallel>, #tpu.dimension_semantics<arbitrary>], iteration_bounds = array<i64: 2, 2>, scalar_prefetch = 0 : i64, scratch_operands = 1 : i64, tpu.core_type = #tpu.core_type<tc>, window_params = [{pipeline_mode = #tpu.pipeline_mode<synchronous>, transform_indices = @transform_0, window_bounds = array<i64: 16, 16>}, {pipeline_mode = #tpu.pipeline_mode<synchronous>, transform_indices = @transform_1, window_bounds = array<i64: 16, 16>}, {pipeline_mode = #tpu.pipeline_mode<synchronous>, transform_indices = @transform_2, window_bounds = array<i64: 16, 16>}, {pipeline_mode = #tpu.pipeline_mode<synchronous>, transform_indices = @transform_3, window_bounds = array<i64: 16, 16>}, {transform_indices = @transform_4, window_bounds = array<i64: 1, 16, 16>}, {transform_indices = @transform_5, window_bounds = array<i64: 1, 3, 16, 16>}, {transform_indices = @transform_6, window_bounds = array<i64: 1, 16, 16>}]} {
    %c0_i32 = arith.constant 0 : i32
    %0 = arith.cmpi eq, %arg1, %c0_i32 : i32
    %1 = arith.extui %0 : i1 to i32
    %c0_i32_0 = arith.constant 0 : i32
    %2 = arith.cmpi ne, %1, %c0_i32_0 : i32
    scf.if %2 {
      %c0_28 = arith.constant 0 : index
      %c0_29 = arith.constant 0 : index
      %c0_30 = arith.constant 0 : index
      %27 = vector.load %arg6[%c0_28, %c0_29, %c0_30] : memref<1x16x16xf32, #tpu.memory_space<vmem>>, vector<1x16x16xf32>
      %28 = vector.shape_cast %27 : vector<1x16x16xf32> to vector<16x16xf32>
      %c0_31 = arith.constant 0 : index
      %c0_32 = arith.constant 0 : index
      %29 = vector.load %arg9[%c0_31, %c0_32] : memref<16x16xf32, #tpu.memory_space<vmem>>, vector<16x16xf32>
      tpu.vector_store %arg9[%c0_31, %c0_32], %28 {strides = array<i32>} : memref<16x16xf32, #tpu.memory_space<vmem>>, vector<16x16xf32>,
    } else {
    }
    %c0 = arith.constant 0 : index
    %c0_1 = arith.constant 0 : index
    %3 = vector.load %arg9[%c0, %c0_1] : memref<16x16xf32, #tpu.memory_space<vmem>>, vector<16x16xf32>
    %c0_2 = arith.constant 0 : index
    %c0_3 = arith.constant 0 : index
    %c0_4 = arith.constant 0 : index
    %c0_5 = arith.constant 0 : index
    %4 = vector.load %arg7[%c0_2, %c0_3, %c0_4, %c0_5] : memref<1x3x16x16xf32, #tpu.memory_space<vmem>>, vector<1x1x16x16xf32>
    %5 = vector.shape_cast %4 : vector<1x1x16x16xf32> to vector<16x16xf32>
    %c0_6 = arith.constant 0 : index
    %c1 = arith.constant 1 : index
    %c0_7 = arith.constant 0 : index
    %c0_8 = arith.constant 0 : index
    %6 = vector.load %arg7[%c0_6, %c1, %c0_7, %c0_8] : memref<1x3x16x16xf32, #tpu.memory_space<vmem>>, vector<1x1x16x16xf32>
    %7 = vector.shape_cast %6 : vector<1x1x16x16xf32> to vector<16x16xf32>
    %c0_9 = arith.constant 0 : index
    %c2 = arith.constant 2 : index
    %c0_10 = arith.constant 0 : index
    %c0_11 = arith.constant 0 : index
    %8 = vector.load %arg7[%c0_9, %c2, %c0_10, %c0_11] : memref<1x3x16x16xf32, #tpu.memory_space<vmem>>, vector<1x1x16x16xf32>
    %9 = vector.shape_cast %8 : vector<1x1x16x16xf32> to vector<16x16xf32>
    %c0_12 = arith.constant 0 : index
    %c0_13 = arith.constant 0 : index
    %10 = vector.load %arg2[%c0_12, %c0_13] : memref<16x16xf32, #tpu.memory_space<vmem>>, vector<16x16xf32>
    %c0_14 = arith.constant 0 : index
    %c0_15 = arith.constant 0 : index
    %11 = vector.load %arg3[%c0_14, %c0_15] : memref<16x16xf32, #tpu.memory_space<vmem>>, vector<16x16xf32>
    %cst = arith.constant dense<0.000000e+00> : vector<16x16xf32>
    %12 = tpu.matmul %10, %3, %cst {dimension_numbers = #tpu.dot_dimension_numbers<[1], [0], [0], [1], [0, 0, 1, 1], [], []>} : vector<16x16xf32>, vector<16x16xf32>, vector<16x16xf32> -> vector<16x16xf32>
    %cst_16 = arith.constant dense<0.000000e+00> : vector<16x16xf32>
    %13 = tpu.matmul %11, %5, %cst_16 {dimension_numbers = #tpu.dot_dimension_numbers<[1], [0], [0], [1], [0, 0, 1, 1], [], []>} : vector<16x16xf32>, vector<16x16xf32>, vector<16x16xf32> -> vector<16x16xf32>
    %14 = arith.addf %12, %13 : vector<16x16xf32>
    %cst_17 = arith.constant dense<0.000000e+00> : vector<16x16xf32>
    %15 = tpu.matmul %10, %7, %cst_17 {dimension_numbers = #tpu.dot_dimension_numbers<[1], [0], [0], [1], [0, 0, 1, 1], [], []>} : vector<16x16xf32>, vector<16x16xf32>, vector<16x16xf32> -> vector<16x16xf32>
    %cst_18 = arith.constant dense<0.000000e+00> : vector<16x16xf32>
    %16 = tpu.matmul %11, %9, %cst_18 {dimension_numbers = #tpu.dot_dimension_numbers<[1], [0], [0], [1], [0, 0, 1, 1], [], []>} : vector<16x16xf32>, vector<16x16xf32>, vector<16x16xf32> -> vector<16x16xf32>
    %17 = arith.addf %15, %16 : vector<16x16xf32>
    %c0_19 = arith.constant 0 : index
    %c0_20 = arith.constant 0 : index
    %18 = vector.load %arg4[%c0_19, %c0_20] : memref<16x16xf32, #tpu.memory_space<vmem>>, vector<16x16xf32>
    %cst_21 = arith.constant dense<0.000000e+00> : vector<16x16xf32>
    %19 = tpu.matmul %14, %18, %cst_21 {dimension_numbers = #tpu.dot_dimension_numbers<[1], [0], [0], [1], [0, 0, 1, 1], [], []>} : vector<16x16xf32>, vector<16x16xf32>, vector<16x16xf32> -> vector<16x16xf32>
    %c0_22 = arith.constant 0 : index
    %c0_23 = arith.constant 0 : index
    %20 = vector.load %arg5[%c0_22, %c0_23] : memref<16x16xf32, #tpu.memory_space<vmem>>, vector<16x16xf32>
    %cst_24 = arith.constant dense<0.000000e+00> : vector<16x16xf32>
    %21 = tpu.matmul %17, %20, %cst_24 {dimension_numbers = #tpu.dot_dimension_numbers<[1], [0], [0], [1], [0, 0, 1, 1], [], []>} : vector<16x16xf32>, vector<16x16xf32>, vector<16x16xf32> -> vector<16x16xf32>
    %22 = arith.addf %19, %21 : vector<16x16xf32>
    %c0_25 = arith.constant 0 : index
    %c0_26 = arith.constant 0 : index
    %23 = vector.load %arg9[%c0_25, %c0_26] : memref<16x16xf32, #tpu.memory_space<vmem>>, vector<16x16xf32>
    tpu.vector_store %arg9[%c0_25, %c0_26], %22 {strides = array<i32>} : memref<16x16xf32, #tpu.memory_space<vmem>>, vector<16x16xf32>,
    %c1_i32 = arith.constant 1 : i32
    %24 = arith.cmpi eq, %arg1, %c1_i32 : i32
    %25 = arith.extui %24 : i1 to i32
    %c0_i32_27 = arith.constant 0 : i32
    %26 = arith.cmpi ne, %25, %c0_i32_27 : i32
    scf.if %26 {
      %c0_28 = arith.constant 0 : index
      %c0_29 = arith.constant 0 : index
      %c0_30 = arith.constant 0 : index
      %27 = vector.load %arg8[%c0_28, %c0_29, %c0_30] : memref<1x16x16xf32, #tpu.memory_space<vmem>>, vector<1x16x16xf32>
      %28 = vector.shape_cast %27 : vector<1x16x16xf32> to vector<16x16xf32>
      %29 = vector.shape_cast %22 : vector<16x16xf32> to vector<1x16x16xf32>
      tpu.vector_store %arg8[%c0_28, %c0_29, %c0_30], %29 {strides = array<i32>} : memref<1x16x16xf32, #tpu.memory_space<vmem>>, vector<1x16x16xf32>,
    } else {
    }
    return
  }
  func.func @transform_0(%arg0: i32, %arg1: i32) -> (i32, i32) {
    %c0_i32 = arith.constant 0 : i32
    %c0_i32_0 = arith.constant 0 : i32
    %c0_i32_1 = arith.constant 0 : i32
    return %c0_i32, %c0_i32_0 : i32, i32
  }
  func.func @transform_1(%arg0: i32, %arg1: i32) -> (i32, i32) {
    %c0_i32 = arith.constant 0 : i32
    %c0_i32_0 = arith.constant 0 : i32
    %c0_i32_1 = arith.constant 0 : i32
    return %c0_i32, %c0_i32_0 : i32, i32
  }
  func.func @transform_2(%arg0: i32, %arg1: i32) -> (i32, i32) {
    %c0_i32 = arith.constant 0 : i32
    %c0_i32_0 = arith.constant 0 : i32
    %c0_i32_1 = arith.constant 0 : i32
    return %c0_i32, %c0_i32_0 : i32, i32
  }
  func.func @transform_3(%arg0: i32, %arg1: i32) -> (i32, i32) {
    %c0_i32 = arith.constant 0 : i32
    %c0_i32_0 = arith.constant 0 : i32
    %c0_i32_1 = arith.constant 0 : i32
    return %c0_i32, %c0_i32_0 : i32, i32
  }
  func.func @transform_4(%arg0: i32, %arg1: i32) -> (i32, i32, i32) {
    %c0_i32 = arith.constant 0 : i32
    %c0_i32_0 = arith.constant 0 : i32
    %c0_i32_1 = arith.constant 0 : i32
    return %arg0, %c0_i32, %c0_i32_0 : i32, i32, i32
  }
  func.func @transform_5(%arg0: i32, %arg1: i32) -> (i32, i32, i32, i32) {
    %c2_i32 = arith.constant 2 : i32
    %0 = arith.muli %arg0, %c2_i32 : i32
    %1 = arith.addi %0, %arg1 : i32
    %c0_i32 = arith.constant 0 : i32
    %c0_i32_0 = arith.constant 0 : i32
    %c0_i32_1 = arith.constant 0 : i32
    %c0_i32_2 = arith.constant 0 : i32
    return %1, %c0_i32, %c0_i32_0, %c0_i32_1 : i32, i32, i32, i32
  }
  func.func @transform_6(%arg0: i32, %arg1: i32) -> (i32, i32, i32) {
    %c0_i32 = arith.constant 0 : i32
    %c0_i32_0 = arith.constant 0 : i32
    %c0_i32_1 = arith.constant 0 : i32
    return %arg0, %c0_i32, %c0_i32_0 : i32, i32, i32
  }
}

</mosaic_0001>

<bundles_post_ra>
// kernel: tpu_custom_call.1
= control target key start
LH: loop header
LB: loop body
LE: loop exit
PB: predicated region body
PF: predicated region fallthrough
CT: control target
= control target key end

     0   :  { %s2011_s0 = inlined_call_operand.hbm [shape: f32[16,16], index: 0, kind: input, shape index: {}]   ;;  %s2012_s1 = inlined_call_operand.hbm [shape: f32[16,16], index: 1, kind: input, shape index: {}]   ;;  %s2013_s2 = inlined_call_operand.hbm [shape: f32[16,16], index: 2, kind: input, shape index: {}]   ;;  %s2014_s3 = inlined_call_operand.hbm [shape: f32[16,16], index: 3, kind: input, shape index: {}]   ;;  %s2015_s4 = inlined_call_operand.hbm [shape: f32[2,16,16], index: 4, kind: input, shape index: {}]   ;;  %s2016_s5 = inlined_call_operand.hbm [shape: f32[4,3,16,16], index: 5, kind: input, shape index: {}]   ;;  %s2017_s6 = inlined_call_operand.hbm [shape: f32[2,16,16], index: 6, kind: output, shape index: {}]  }
   0x1   :  { %2037 = sst [smem:[#allocation28_spill]] %s2011_s0 }
   0x2   :  { %2038 = sst [smem:[#allocation29_spill]] %s2012_s1 }
   0x3   :  { %2039 = sst [smem:[#allocation30_spill]] %s2013_s2 }
   0x4   :  { %2040 = sst [smem:[#allocation31_spill]] %s2014_s3 }
   0x5   :  { %2041 = sst [smem:[#allocation32_spill]] %s2015_s4 }
   0x6   :  { %2042 = sst [smem:[#allocation33_spill]] %s2017_s6 }
   0x7   :  { %11 = vsyncpa [#allocation4], 0 }
   0x8   :  { %12 = vsyncpa [#allocation7], 0 }
   0x9   :  { %13 = vsyncpa [#allocation10], 0 }
   0xa   :  { %14 = vsyncpa [#allocation5], 0 }
   0xb   :  { %16 = vsyncpa [#allocation5 + $0x1], 0  ;;  %s1663_s21 = smov 0   ;;  %s1665_s22 = smov 0  }
   0xc   :  { %s1667_s23 = smov 0   ;;  %s1669_s24 = smov 0  }
   0xd   :  { %s1671_s25 = smov 0   ;;  %s1673_s26 = smov 0  }
   0xe   :  { %s1675_s27 = smov 0   ;;  %s1677_s28 = smov 0  }
   0xf   :  { %s1679_s29 = smov 0   ;;  %s1681_s30 = smov 0  }
  0x10   :  { %s1683_s7 = smov 0  }
  0x11 LB: > { %2043 = sst [smem:[#allocation20_spill]] %s1587_s24  ;;  %s1717_s8 = sadd.s32 4294967295, %s1615_s7   ;;  %s1615_s7 = sphi %s1683_s7, %s22_s7   ;;  %s1611_s30 = sphi %s1681_s30, %s2099_s30   ;;  %s1607_s29 = sphi %s1679_s29, %s2098_s29   ;;  %s1603_s28 = sphi %s1677_s28, %s2097_s28   ;;  %s1599_s27 = sphi %s1675_s27, %s2096_s27   ;;  %s1595_s26 = sphi %s1673_s26, %s2095_s26   ;;  %s1591_s25 = sphi %s1671_s25, %s2094_s25   ;;  %s1587_s24 = sphi %s1669_s24, %s2093_s24   ;;  %s1583_s23 = sphi %s1667_s23, %s2092_s23   ;;  %s1579_s22 = sphi %s1665_s22, %s2091_s22   ;;  %s1575_s21 = sphi %s1663_s21, %s2090_s21  }
  0x12   : > { %2044 = sst [smem:[#allocation21_spill]] %s1599_s27  ;;  %s1052_s9 = sadd.s32 4294967294, %s1615_s7  }
  0x13   : > { %2045 = sst [smem:[#allocation22_spill]] %s1603_s28  ;;  %p138_p0 = scmp.ne.s32.totalorder %s1591_s25, %s1587_s24 }
  0x14   : > { %2046 = sst [smem:[#allocation23_spill]] %s1607_s29  ;;  %p2025_p1 = scmp.eq.s32.totalorder %s1717_s8, 0 }
  0x15   : > { %2047 = sst [smem:[#allocation24_spill]] %s1615_s7  ;;  %p168_p2 = scmp.ne.s32.totalorder %s1579_s22, %s1575_s21 }
  0x16   : > { %p1727_p4 = por %p2025_p1, %p138_p0  ;;  %p198_p5 = scmp.eq.s32.totalorder %s1052_s9, 3 }
  0x17   : > { %p1733_p6 = por %p168_p2, %p2025_p1  ;;  %p1055_p7 = scmp.ge.s32.totalorder %s1615_s7, 1 }
  0x18   : > { %p1738_p8 = por %p198_p5, %p138_p0  ;;  %p205_p9 = scmp.lt.s32.totalorder %s1615_s7, 5 }
  0x19   : > { %s2049_s11 = scalar_select %p1733_p6, 1, 0 }
  0x1a   : > { %s2051_s12 = scalar_select %p1738_p8, 1, 0 }
  0x1b   : > { %2050 = sst [smem:[#allocation25_spill]] %s2049_s11  ;;  %p1743_p10 = pnand %p1055_p7, %p205_p9 }
  0x1c   : > { %2052 = sst [smem:[#allocation26_spill]] %s2051_s12  ;;  %s1617_s14 = smov [#allocation3]  }
  0x1d   : > { %s217_s15 = sshll.u32 %s1617_s14, 4  ;;  %p1189_p11 = pneg %p1743_p10  ;;  %s218_s15 = int_to_ptr.vmem [resolvable:$true] %s217_s15 }
  0x1e   : > { %s1618_s17 = smov [#allocation6]   ;;  %s1330_s19 = scalar_lea.vmem %s218_s15, 256 }
  0x1f   : > { %p1751_p12 = pnand %p1189_p11, %p2025_p1  ;;  %s230_s18 = sshll.u32 %s1618_s17, 4  ;;  %s231_s18 = int_to_ptr.vmem [resolvable:$true] %s230_s18 }
  0x20   : > { %p1331_p0 = scmp.ne.s32.totalorder %s218_s15, %s1330_s19  ;;  %p1338_p7 = scmp.lt.s32.totalorder %s218_s15, %s218_s15 }
  0x21   : > { %p2028_p13 = pneg %p1751_p12  ;;  %p1339_p9 = scmp.lt.s32.totalorder %s1330_s19, %s1330_s19 }
  0x23   : > { %p1333_p2 = pnand %p1331_p0, %p2028_p13  ;;  %p1340_p3 = por %p1339_p9, %p1338_p7 }
  0x25   : > { %p1334_p5 = pneg %p1333_p2 }
  0x27   : > { %p1341_p11 = pnand %p1340_p3, %p1334_p5 }
  0x29   : > { %1344 = shalt.err (!%p1341_p11)
}
  0x2a   : > { %s2021_s20 = smov 128   ;;  %s2023_s21 = smov 8  }
  0x2b   : > { %s2055_s0 = sld [smem:[#allocation28_spill]]  ;;  %s1356_s17 = scalar_lea.vmem %s231_s18, 256 }
  0x2c   : > { %p1357_p0 = scmp.ne.s32.totalorder %s231_s18, %s1356_s17  ;;  %p1364_p3 = scmp.lt.s32.totalorder %s231_s18, %s231_s18 }
  0x2d   : > { %p1365_p5 = scmp.lt.s32.totalorder %s1356_s17, %s1356_s17 }
  0x2e   : > { %p1359_p2 = pnand %p1357_p0, %p2028_p13 }
  0x2f   : > { %p1366_p9 = por %p1365_p5, %p1364_p3 }
  0x30   : > { %p1360_p7 = pneg %p1359_p2 }
  0x31   : > { %1192 = dma.hbm_to_vmem [thread:$0]  (!%p1751_p12), %s2055_s0, 256, %s218_s15, [#allocation4], %s2021_s20, %s2021_s20, %s2023_s21  }
  0x32   : > { %p1367_p11 = pnand %p1366_p9, %p1360_p7 }
  0x34   : > { %1370 = shalt.err (!%p1367_p11)
}
  0x35   : > { %s2056_s1 = sld [smem:[#allocation29_spill]]  ;;  %p132_p0 = scmp.ne.s32.totalorder %s1595_s26, %s1591_s25 }
  0x36   : > { %p2026_p2 = scmp.eq.s32.totalorder %s1615_s7, 0  ;;  %p2027_p7 = scmp.lt.s32.totalorder %s1615_s7, 4 }
  0x37   : > { %p2057_p3 = scmp.eq.s32.totalorder %s1717_s8, 3  ;;  %s270_s12 = sand.u32 1, %s1615_s7  }
  0x38   : > { %p134_p9 = por %p2026_p2, %p132_p0  ;;  %s272_s14 = sand.u32 1, %s1595_s26  }
  0x39   : > { %p1786_p5 = por %p2057_p3, %p132_p0  ;;  %s1096_s17 = sshll.u32 %s1611_s30, 8 }
  0x3a   : > { %s1061_s19 = sshll.u32 %s272_s14, 4  ;;  %s2060_s4 = sld [smem:[#allocation32_spill]] }
  0x3b   : > { %1195 = dma.hbm_to_vmem [thread:$0]  (!%p1751_p12), %s2056_s1, 256, %s231_s18, [#allocation7], %s2021_s20, %s2021_s20, %s2023_s21  }
  0x3c   : > { %s2058_s9 = scalar_select %p1786_p5, 1, 0 }
  0x3d   : > { %p1800_p11 = pnand %p2027_p7, %p134_p9  ;;  %s274_s15 = scalar_lea.vmem [#allocation11], %s1061_s19 }
  0x3e   : > { %2059 = sst [smem:[#allocation27_spill]] %s2058_s9  ;;  %s281_s20 = sshll.u32 %s274_s15, 4  ;;  %s282_s20 = int_to_ptr.vmem [resolvable:$true] %s281_s20 }
  0x3f   : > { %s1804_s21 = scalar_lea.sflag [#allocation4], %s270_s12  ;;  %p1373_p0 = pneg %p1800_p11 }
  0x40   : > { %s280_s6 = scalar_lea.hbm %s2060_s4, %s1096_s17  ;;  %s1384_s1 = scalar_lea.vmem %s282_s20, 256 }
  0x41   : > { %p1385_p3 = scmp.ne.s32.totalorder %s282_s20, %s1384_s1  ;;  %s1621_s14 = smov [#allocation11]  }
  0x42   : > { %s1389_s0 = sshll.u32 %s1621_s14, 4  ;;  %s1390_s0 = int_to_ptr.vmem [resolvable:$false] %s1389_s0 }
  0x43   : > { %p1387_p1 = pnand %p1385_p3, %p1373_p0  ;;  %s1391_s24 = scalar_lea.vmem %s1390_s0, 512 }
  0x44   : > { %p1392_p9 = scmp.lt.s32.totalorder %s282_s20, %s1390_s0  ;;  %p1393_p7 = scmp.lt.s32.totalorder %s1391_s24, %s1384_s1 }
  0x45   : > { %p1388_p2 = pneg %p1387_p1 }
  0x46   : > { %p1394_p13 = por %p1393_p7, %p1392_p9 }
  0x48   : > { %p1395_p8 = pnand %p1394_p13, %p1388_p2 }
  0x4a   : > { %1398 = shalt.err (!%p1395_p8)
}
  0x4b   : > { %s2062_s15 = smov 8   ;;  %s2063_s12 = smov 128  }
  0x4c   : > { %1205 = dma.hbm_to_vmem [thread:$0]  (!%p1800_p11), %s280_s6, 256, %s282_s20, %s1804_s21, %s2063_s12, %s2063_s12, %s2062_s15  }
  0x4d   : > { %s1622_s17 = smov [#allocation8]   ;;  %s1623_s4 = smov [#allocation9]  }
  0x4e   : > { %s243_s19 = sshll.u32 %s1622_s17, 4  ;;  %s256_s14 = sshll.u32 %s1623_s4, 4  ;;  %s244_s19 = int_to_ptr.vmem [resolvable:$true] %s243_s19  ;;  %s257_s14 = int_to_ptr.vmem [resolvable:$true] %s256_s14 }
  0x4f   : > { %s1410_s9 = scalar_lea.vmem %s244_s19, 256  ;;  %p2064_p0 = pneg %p1751_p12 }
  0x50   : > { %p1411_p1 = scmp.ne.s32.totalorder %s244_s19, %s1410_s9  ;;  %p1418_p8 = scmp.lt.s32.totalorder %s244_s19, %s244_s19 }
  0x51   : > { %p1419_p2 = scmp.lt.s32.totalorder %s1410_s9, %s1410_s9 }
  0x52   : > { %p1413_p7 = pnand %p1411_p1, %p2064_p0 }
  0x53   : > { %p1420_p3 = por %p1419_p2, %p1418_p8 }
  0x54   : > { %p1414_p13 = pneg %p1413_p7 }
  0x56   : > { %p1421_p9 = pnand %p1420_p3, %p1414_p13 }
  0x58   : > { %1424 = shalt.err (!%p1421_p9)
}
  0x59   : > { %s2065_s2 = sld [smem:[#allocation30_spill]]  ;;  %s1436_s4 = scalar_lea.vmem %s257_s14, 256 }
  0x5a   : > { %p1437_p11 = scmp.ne.s32.totalorder %s257_s14, %s1436_s4  ;;  %p2066_p1 = pmov %p2064_p0 }
  0x5b   : > { %p1444_p8 = scmp.lt.s32.totalorder %s257_s14, %s257_s14  ;;  %p1445_p13 = scmp.lt.s32.totalorder %s1436_s4, %s1436_s4 }
  0x5c   : > { %p1439_p0 = pnand %p1437_p11, %p2066_p1 }
  0x5d   : > { %p1446_p2 = por %p1445_p13, %p1444_p8 }
  0x5e   : > { %p1440_p7 = pneg %p1439_p0 }
  0x5f   : > { %1198 = dma.hbm_to_vmem [thread:$0]  (!%p1751_p12), %s2065_s2, 256, %s244_s19, [#allocation7], %s2063_s12, %s2063_s12, %s2062_s15  }
  0x60   : > { %p1447_p3 = pnand %p1446_p2, %p1440_p7 }
  0x62   : > { %1450 = shalt.err (!%p1447_p3)
}
  0x63   : > { %s2067_s3 = sld [smem:[#allocation31_spill]]  ;;  %s34_s18 = sadd.s32 1, %s1611_s30 }
  0x64   : > { %s31_s16 = sadd.s32 1, %s1607_s29  ;;  %s1053_s0 = sshll.u32 %s1611_s30, 1 }
  0x65   : > { %p32_p9 = scmp.ge.s32.totalorder %s31_s16, 2  ;;  %s149_s24 = sadd.s32 %s1607_s29, %s1053_s0 }
  0x66   : > { %s155_s17 = sadd.s32 1, %s1583_s23  ;;  %p162_p11 = scmp.ne.s32.totalorder %s1583_s23, %s1579_s22 }
  0x67   : > { %s2101_s16 = smov (%p32_p9, %s31_s16), 0  ;;  %s2103_s18 = smov (!%p32_p9, %s34_s18), %s1611_s30 }
  0x68   : > { %p2068_p1 = scmp.eq.s32.totalorder %s1615_s7, 0  ;;  %s293_s19 = sand.u32 1, %s1583_s23  }
  0x69   : > { %1201 = dma.hbm_to_vmem [thread:$0]  (!%p1751_p12), %s2067_s3, 256, %s257_s14, [#allocation10], %s2063_s12, %s2063_s12, %s2062_s15  }
  0x6a   : > { %p164_p0 = por %p162_p11, %p2068_p1  ;;  %p36_p7 = scmp.ge.s32.totalorder %s2103_s18, 2 }
  0x6b   : > { %s1164_s14 = smul.u32 48, %s293_s19  ;;  %p2069_p12 = scmp.lt.s32.totalorder %s1615_s7, 4 }
  0x6c   : > { %s1165_s1 = smul.u32 768, %s149_s24  ;;  %s2105_s18 = smov (%p36_p7, %s2103_s18), 0 }
  0x6d   : > { %p1851_p8 = pnand %p2069_p12, %p164_p0  ;;  %s122_s0 = ssub.s32 %s1611_s30, %s2105_s18 }
  0x6e   : > { %s1860_s9 = scalar_lea.hbm %s2016_s5, %s1165_s1  ;;  %s1054_s2 = sshll.u32 %s2105_s18, 1 }
  0x6f   : > { %p123_p13 = scmp.eq.s32.totalorder %s122_s0, 0  ;;  %s151_s19 = sadd.s32 %s1054_s2, %s2101_s16 }
  0x70   : > { %s152_s3 = ssub.s32 %s149_s24, %s151_s19  ;;  %s295_s29 = scalar_lea.vmem [#allocation12], %s1164_s14 }
  0x71   : > { %s304_s7 = sshll.u32 %s295_s29, 4  ;;  %s2071_s28 = sadd.s32 1, %s1595_s26  ;;  %s305_s7 = int_to_ptr.vmem [resolvable:$true] %s304_s7 }
  0x72   : > { %s1869_s27 = scalar_select %p123_p13, %s1595_s26, %s2071_s28  }
  0x73   : > { %p153_p2 = scmp.eq.s32.totalorder %s152_s3, 0  ;;  %p1453_p3 = pneg %p1851_p8 }
  0x74   : > { %s1464_s4 = scalar_lea.vmem %s305_s7, 768  ;;  %s1624_s1 = smov [#allocation12]  }
  0x75   : > { %s1872_s11 = scalar_select %p153_p2, %s1583_s23, %s155_s17  }
  0x76   : > { %p1465_p9 = scmp.ne.s32.totalorder %s305_s7, %s1464_s4  ;;  %s1469_s20 = sshll.u32 %s1624_s1, 4  ;;  %s1470_s20 = int_to_ptr.vmem [resolvable:$false] %s1469_s20 }
  0x77   : > { %s1471_s2 = scalar_lea.vmem %s1470_s20, 1536  ;;  %p1472_p0 = scmp.lt.s32.totalorder %s305_s7, %s1470_s20 }
  0x78   : > { %p1467_p11 = pnand %p1465_p9, %p1453_p3  ;;  %p1473_p7 = scmp.lt.s32.totalorder %s1471_s2, %s1464_s4 }
  0x7a   : > { %p1468_p1 = pneg %p1467_p11  ;;  %p1474_p12 = por %p1473_p7, %p1472_p0 }
  0x7c   : > { %p1475_p5 = pnand %p1474_p12, %p1468_p1 }
  0x7e   : > { %1478 = shalt.err (!%p1475_p5)
}
  0x7f   : > { %1208 = dma.hbm_to_vmem [thread:$0]  (!%p1851_p8), %s1860_s9, 768, %s305_s7, %s1804_s21, %s2063_s12, %s2063_s12, %s2062_s15  }
  0x80   : > { %316 = sbr.rel (%p1743_p10) target bundleno = 605 (0x25d), region = 44  ;;  %p2072_p13 = scmp.eq.s32.totalorder (!%p1743_p10), %s1717_s8, 0 }
  0x85   : > { %1550 = dma.done.wait (%p2072_p13), [#allocation4], 256   ;;  %p2073_p2 = pmov %p2072_p13 }
  0x87   : > { %1552 = vsyncadd (%p2073_p2), [#allocation4], 4294967040  ;;  %p2074_p3 = pmov %p2073_p2 }
  0x88   : > { %p2075_p5 = pmov %p2073_p2 }
  0x89   : > { %1554 = dma.done.wait (%p2074_p3), [#allocation7], 512  }
  0x8a   : > { %1556 = vsyncadd (%p2075_p5), [#allocation7], 4294966784  ;;  %p2076_p9 = pmov %p2073_p2 }
  0x8b   : > { %p2077_p8 = pmov %p2073_p2 }
  0x8c   : > { %1558 = dma.done.wait (%p2076_p9), [#allocation10], 256  }
  0x8d   : > { %1560 = vsyncadd (%p2077_p8), [#allocation10], 4294967040  ;;  %s334_s3 = sand.u32 1, %s1717_s8   ;;  %s336_s28 = sand.u32 1, %s1591_s25  }
  0x8e   : > { %s1071_s29 = sshll.u32 %s336_s28, 4  ;;  %s335_s7 = scalar_lea.sflag [#allocation4], %s334_s3 }
  0x8f   : > { %s338_s13 = scalar_lea.vmem [#allocation11], %s1071_s29 }
  0x90   : > { %1562 = dma.done.wait (%p1727_p4), %s335_s7, 256  }
  0x91   : > { %1564 = vsyncadd (%p1727_p4), %s335_s7, 4294967040  ;;  %s345_s15 = sand.u32 1, %s1579_s22  }
  0x92   : > { %s1166_s12 = smul.u32 48, %s345_s15 }
  0x94   : > { %s1906_s24 = scalar_lea.vmem [#allocation12], %s1166_s12 }
  0x95   : > { %1566 = dma.done.wait (%p1733_p6), %s335_s7, 768  }
  0x96   : > { %1568 = vsyncadd (%p1733_p6), %s335_s7, 4294966528  ;;  %s1912_s8 = scalar_lea.vmem [#allocation13], %s1071_s29  ;;  %s2079_s17 = sld [smem:[#allocation21_spill]] }
  0x9c   : > { %p1073_p10 = scmp.ne.s32.totalorder %s2079_s17, 0 }
  0x9e   : > { %386 = sbr.rel (%p1073_p10) target bundleno = 165 (0xa5), region = 72 }
  0xa3   : > { %v387_v0 = vld [vmem:[%s338_s13] sm:$0xff]  ;;  %vm389_vm0 = vcmask 130048   ;;  %v388_v1 = vld [vmem:[%s338_s13 + $0x8] sm:$0xff] }
  0xa4   : > { %390 = vst.msk [vmem:[#allocation2] sm:$0xff] %vm389_vm0, %v387_v0  ;;  %391 = vst.msk [vmem:[#allocation2 + $0x8] sm:$0xff] %vm389_vm0, %v388_v1 }
  0xa5 PF: > { %v395_v2 = vld [vmem:[%s1906_s24 + $0x8] sm:$0xff]  ;;  %v394_v4 = vld [vmem:[%s1906_s24] sm:$0xff]  ;;  %vm406_vm1 = vcmask 130048   ;;  %v1075_v11 = vld [vmem:[%s1906_s24 + $0x18] sm:$0xff]  ;;  %s2080_s10 = sld [smem:[#allocation21_spill]] }
  0xa6   : > { %1122 = vmatprep.subr.mxu0 %v395_v2  ;;  %v404_v6 = vld [vmem:[#allocation6] sm:$0xff]  ;;  %v402_v7 = vld [vmem:[#allocation3] sm:$0xff]  ;;  %v405_v8 = vld [vmem:[#allocation6 + $0x8] sm:$0xff] }
  0xa7   : > { %1123 = vmatpush3.msra.mxu0 %v395_v2  ;;  %v403_v9 = vld [vmem:[#allocation3 + $0x8] sm:$0xff]  ;;  %1126 = vmatprep.mubr.msk.f32.mxu0 %vm406_vm1, %v404_v6  ;;  %v1076_v12 = vld [vmem:[%s1906_s24 + $0x20] sm:$0xff]  ;;  %v1074_v13 = vld [vmem:[%s1906_s24 + $0x10] sm:$0xff] }
  0xa8   : > { %1124 = vmatprep.subr.mxu0 %v394_v4  ;;  %v1077_v10 = vld [vmem:[%s1906_s24 + $0x28] sm:$0xff]  ;;  %1133 = vmatprep.mubr.msk.f32.mxu1 %vm406_vm1, %v402_v7  ;;  %v719_v15 = vld [vmem:[#allocation8] sm:$0xff]  ;;  %v721_v17 = vld [vmem:[#allocation9] sm:$0xff] }
  0xa9   : > { %1125 = vmatpush3.msra.mxu0 %v394_v4  ;;  %v720_v14 = vld [vmem:[#allocation8 + $0x8] sm:$0xff]  ;;  %v722_v16 = vld [vmem:[#allocation9 + $0x8] sm:$0xff] }
  0xaa   : > { %1127 = vmatmul.mubr.msk.f32.vlgmr.msra.gmra.mxu0 %vm406_vm1, %v405_v8  ;;  %1136 = vmatprep.subr.mxu0 %v1077_v10 }
  0xab   : > { %v393_v3 = vld [vmem:[#allocation2 + $0x8] sm:$0xff]  ;;  %v392_v5 = vld [vmem:[#allocation2] sm:$0xff]  ;;  %1137 = vmatpush3.msra.mxu0 %v1077_v10  ;;  %1140 = vmatprep.mubr.msk.f32.mxu0 %vm406_vm1, %v404_v6  ;;  %p1090_p4 = scmp.ne.s32.totalorder %s2080_s10, 1 }
  0xac   : > { %1129 = vmatprep.subr.mxu1 %v393_v3  ;;  %1138 = vmatprep.subr.mxu0 %v1076_v12 }
  0xad   : > { %1130 = vmatpush3.msra.mxu1 %v393_v3  ;;  %1139 = vmatpush3.msra.mxu0 %v1076_v12 }
  0xae   : > { %1131 = vmatprep.subr.mxu1 %v392_v5  ;;  %1141 = vmatmul.mubr.msk.f32.vlgmr.msra.gmra.mxu0 %vm406_vm1, %v405_v8 }
  0xaf   : > { %1132 = vmatpush3.msra.mxu1 %v392_v5  ;;  %1150 = vmatprep.subr.mxu0 %v722_v16 }
  0xb0   : > { %1134 = vmatmul.mubr.msk.f32.vlgmr.msra.gmra.mxu1 %vm406_vm1, %v403_v9  ;;  %1143 = vmatprep.subr.mxu1 %v1075_v11 }
  0xb1   : > { %1144 = vmatpush3.msra.mxu1 %v1075_v11  ;;  %1147 = vmatprep.mubr.msk.f32.mxu1 %vm406_vm1, %v402_v7 }
  0xb2   : > { %1145 = vmatprep.subr.mxu1 %v1074_v13  ;;  %1151 = vmatpush3.msra.mxu0 %v722_v16 }
  0xb3   : > { %1146 = vmatpush3.msra.mxu1 %v1074_v13  ;;  %1152 = vmatprep.subr.mxu0 %v721_v17 }
  0xb4   : > { %1148 = vmatmul.mubr.msk.f32.vlgmr.msra.gmra.mxu1 %vm406_vm1, %v403_v9  ;;  %1157 = vmatprep.subr.mxu1 %v720_v14 }
  0xb5   : > { %1158 = vmatpush3.msra.mxu1 %v720_v14  ;;  %1153 = vmatpush3.msra.mxu0 %v721_v17 }
  0xb6   : > { %1159 = vmatprep.subr.mxu1 %v719_v15 }
  0xb7   : > { %1160 = vmatpush3.msra.mxu1 %v719_v15 }
 0x16a   : > { %v1128_v18 = vpop.f32.mrf.mxu0 }
 0x16c   : > { %v479_v20 = vpop.f32.mrf.mxu0 }
 0x16e   : > { %v1142_v24 = vpop.f32.mrf.mxu0 }
 0x170   : > { %v1135_v19 = vpop.f32.mrf.mxu1  ;;  %v635_v26 = vpop.f32.mrf.mxu0 }
 0x171   : > { %v566_v23 = vadd.f32 %v1135_v19, %v1128_v18 }
 0x172   : > { %v560_v21 = vpop.f32.mrf.mxu1 }
 0x173   : > { %v561_v22 = vadd.f32 %v560_v21, %v479_v20 }
 0x174   : > { %v1149_v25 = vpop.f32.mrf.mxu1 }
 0x175   : > { %1161 = vmatprep.mubr.msk.f32.mxu1 %vm406_vm1, %v561_v22  ;;  %v716_v29 = vadd.f32 %v1149_v25, %v1142_v24 }
 0x176   : > { %1162 = vmatmul.mubr.msk.f32.vlgmr.msra.gmra.mxu1 %vm406_vm1, %v566_v23  ;;  %v710_v27 = vpop.f32.mrf.mxu1 }
 0x177   : > { %v711_v28 = vadd.f32 %v710_v27, %v635_v26 }
 0x179   : > { %1154 = vmatprep.mubr.msk.f32.mxu0 %vm406_vm1, %v711_v28 }
 0x17a   : > { %1155 = vmatmul.mubr.msk.f32.vlgmr.msra.gmra.mxu0 %vm406_vm1, %v716_v29 }
 0x236   : > { %v1163_v30 = vpop.f32.mrf.mxu1 }
 0x238   : > { %v876_v33 = vpop.f32.mrf.mxu1 }
 0x23a   : > { %v1156_v31 = vpop.f32.mrf.mxu0 }
 0x23b   : > { %v882_v32 = vadd.f32 %v1163_v30, %v1156_v31  ;;  %890 = sbr.rel (%p1090_p4) target bundleno = 577 (0x241), region = 76 }
 0x23c   : > { %v795_v34 = vpop.f32.mrf.mxu0 }
 0x23d   : > { %886 = vst.msk [vmem:[#allocation2 + $0x8] sm:$0xff] %vm406_vm1, %v882_v32  ;;  %v877_v35 = vadd.f32 %v876_v33, %v795_v34 }
 0x23f   : > { %885 = vst.msk [vmem:[#allocation2] sm:$0xff] %vm406_vm1, %v877_v35 }
 0x240   : > { %891 = vst.msk [vmem:[%s1912_s8] sm:$0xff] %vm406_vm1, %v877_v35  ;;  %892 = vst.msk [vmem:[%s1912_s8 + $0x8] sm:$0xff] %vm406_vm1, %v882_v32 }
 0x241 PF: > { %s2081_s14 = sld [smem:[#allocation22_spill]]  ;;  %s907_s20 = sshll.u32 %s1912_s8, 4  ;;  %s1947_s20 = int_to_ptr.vmem [resolvable:$true] %s907_s20 }
 0x242   : > { %s2082_s6 = sld [smem:[#allocation27_spill]]  ;;  %s1951_s2 = scalar_lea.sflag [#allocation5], %s336_s28 }
 0x243   : > { %s2083_s4 = sld [smem:[#allocation33_spill]]  ;;  %s1479_s3 = scalar_lea.vmem %s1947_s20, 256 }
 0x244   : > { %p1480_p6 = scmp.ne.s32.totalorder %s1947_s20, %s1479_s3  ;;  %s1625_s29 = smov [#allocation13]  }
 0x245   : > { %s1483_s7 = sshll.u32 %s1625_s29, 4  ;;  %s1484_s7 = int_to_ptr.vmem [resolvable:$false] %s1483_s7 }
 0x246   : > { %s1485_s13 = scalar_lea.vmem %s1484_s7, 512  ;;  %p1486_p7 = scmp.lt.s32.totalorder %s1947_s20, %s1484_s7 }
 0x247   : > { %s1097_s9 = sshll.u32 %s2081_s14, 8  ;;  %p1487_p12 = scmp.lt.s32.totalorder %s1485_s13, %s1479_s3 }
 0x248   : > { %p2084_p11 = scmp.ne.s32.totalorder %s2082_s6, 0 }
 0x249   : > { %s1944_s1 = scalar_lea.hbm %s2083_s4, %s1097_s9  ;;  %p1488_p13 = por %p1487_p12, %p1486_p7 }
 0x24a   : > { %p1481_p1 = pnand %p1480_p6, %p2084_p11 }
 0x24c   : > { %p1482_p0 = pneg %p1481_p1 }
 0x24e   : > { %p1489_p2 = pnand %p1488_p13, %p1482_p0 }
 0x250   : > { %1492 = shalt.err (!%p1489_p2)
}
 0x251   : > { %s1493_s28 = scalar_lea.hbm %s1944_s1, 256  ;;  %s1497_s12 = scalar_lea.hbm %s2083_s4, 512 }
 0x252   : > { %p1494_p3 = scmp.ne.s32.totalorder %s1944_s1, %s1493_s28  ;;  %p1498_p8 = scmp.lt.s32.totalorder %s1944_s1, %s2083_s4 }
 0x253   : > { %p1499_p10 = scmp.lt.s32.totalorder %s1497_s12, %s1493_s28 }
 0x254   : > { %p1495_p5 = pnand %p1494_p3, %p2084_p11 }
 0x255   : > { %p1500_p4 = por %p1499_p10, %p1498_p8 }
 0x256   : > { %p1496_p9 = pneg %p1495_p5 }
 0x258   : > { %p1501_p6 = pnand %p1500_p4, %p1496_p9 }
 0x25a   : > { %1504 = shalt.err (!%p1501_p6)
}
 0x25b   : > { %s1626_s17 = smov 128   ;;  %s1627_s10 = smov 8  }
 0x25c   : > { %1187 = dma.vmem_to_hbm [thread:$0]  (%p2084_p11), %s1947_s20, 256, %s1944_s1, %s1951_s2, %s1626_s17, %s1626_s17, %s1627_s10  }
 0x25d PF: > { %s2085_s14 = sld [smem:[#allocation24_spill]] }
 0x25e   : > { %s2086_s9 = sld [smem:[#allocation20_spill]] }
 0x25f   : > { %s2087_s0 = sld [smem:[#allocation26_spill]] }
 0x263   : > { %p1222_p1 = scmp.ge.s32.totalorder %s2085_s14, 2 }
 0x264   : > { %s922_s19 = sand.u32 1, %s2086_s9  }
 0x265   : > { %p2088_p0 = scmp.ne.s32.totalorder %s2087_s0, 0  ;;  %s923_s3 = scalar_lea.sflag [#allocation5], %s922_s19 }
 0x267   : > { %p1210_p7 = pnand %p1222_p1, %p2088_p0 }
 0x269   : > { %p1211_p12 = pneg %p1210_p7 }
 0x26b   : > { %1570 = dma.done.wait (%p1211_p12), %s923_s3, 256  }
 0x26c   : > { %1572 = vsyncadd (%p1211_p12), %s923_s3, 4294967040  ;;  %s22_s7 = sadd.s32 1, %s2085_s14   ;;  %s2089_s6 = sld [smem:[#allocation23_spill]] }
 0x26d   : > { %p19_p13 = scmp.ge.s32.totalorder %s22_s7, 6   ;;  %s2090_s21 = smov %s1579_s22 }
 0x26e   : > { %s2091_s22 = smov %s1583_s23  ;;  %s2092_s23 = smov %s1872_s11 }
 0x26f   : > { %s2093_s24 = smov %s1591_s25  ;;  %s2094_s25 = smov %s1595_s26 }
 0x270   : > { %s2095_s26 = smov %s1869_s27  ;;  %s2097_s28 = smov %s1611_s30 }
 0x271   : > { %s2098_s29 = smov %s2101_s16  ;;  %s2099_s30 = smov %s2105_s18 }
 0x272   : > { %s2096_s27 = smov %s2089_s6  ;;  %21 = sbr.rel (!%p19_p13) target bundleno = 17 (0x11), region = 125 }
 0x277   :  { %928 = vsyncpa [#allocation4], 1 }
 0x278   :  { %930 = vsyncpa [#allocation4 + $0x1], 1 }
 0x279   :  { %931 = vsyncpa [#allocation7], 1 }
 0x27a   :  { %932 = vsyncpa [#allocation10], 1 }
 0x27b   :  { %933 = vsyncpa [#allocation5], 1 }
 0x27c   :  { %935 = vsyncpa [#allocation5 + $0x1], 1 }

</bundles_post_ra>
